<compile_context>
chip_gen: v7x
topology: tpu7x:2x2x1
jax: 0.10.0
libtpu: 0.0.40
codegen_flags: <defaults>
</compile_context>

<pallas_src>
import jax
import jax.numpy as jnp
from jax.experimental import pallas as pl
from jax.experimental.pallas import tpu as pltpu


def _round_up(x, m):
    return ((x + m - 1) // m) * m


def transition_kernel(s_ref, h_ref, w1_ref, b1_ref, w2_ref, b2_ref,
                      g_ref, beta_ref, o_ref):
    """Transposed tiles: features on sublanes, batch on the lane axis.

    s_ref, h_ref : (D, TB)   activation tiles (batch tile on lanes -> dense vld)
    w1_ref       : (4D, 2D)  layer-1 weight (transposed), resident in VMEM
    b1_ref       : (4D, 1)
    w2_ref       : (D, 4D)   layer-2 weight (transposed), resident in VMEM
    b2_ref, g_ref, beta_ref : (D, 1)
    o_ref        : (D, TB)   output tile (dense vst)
    """
    # cat([s, h]) along the feature (sublane) axis -> single K = 2*D matmul.
    x = jnp.concatenate([s_ref[...], h_ref[...]], axis=0)               # (2D, TB)

    # Layer 1: (4D, 2D) @ (2D, TB)
    z = jnp.dot(w1_ref[...], x, preferred_element_type=jnp.float32)     # (4D, TB)
    z = z + b1_ref[...]

    # SiLU: x*sigmoid(x) == 0.5*x*(1 + tanh(x/2))  -- one EUP op, f32 math.
    z = 0.5 * z * (1.0 + jnp.tanh(0.5 * z))

    # Layer 2: (D, 4D) @ (4D, TB)
    y = jnp.dot(w2_ref[...], z, preferred_element_type=jnp.float32)     # (D, TB)
    y = y + b2_ref[...]

    # LayerNorm over the feature (sublane) axis, gamma folded into the scale.
    mean = jnp.mean(y, axis=0, keepdims=True)                           # (1, TB)
    cen = y - mean
    var = jnp.mean(cen * cen, axis=0, keepdims=True)
    inv = jax.lax.rsqrt(var + 1e-5)
    o_ref[...] = (cen * inv) * g_ref[...] + beta_ref[...]


def _pick_batch_tile(B, tile_b_max, num_cores):
    # Small batch: one full-extent block -> single grid step (per-step pipeline
    # overhead ~0.35 us dominates tiny problems).  With 2 TensorCores (v7x),
    # keep >= 2 steps once every core can get a full 128-lane tile.
    if B <= tile_b_max and (num_cores <= 1 or B < 2 * 128):
        return B
    tb = _round_up(pl.cdiv(B, num_cores), 128)       # lane-aligned tiles
    tb = min(tb, _round_up(tile_b_max, 128))
    return max(tb, 128)


def transition_net(s_prev, h_prev, w1, b1, w2, b2, gamma, beta,
                   *, tile_b_max=512, num_cores=None):
    B, D = s_prev.shape
    assert h_prev.shape == (B, D)
    D4 = w1.shape[1]
    assert w1.shape == (2 * D, D4) and w2.shape == (D4, D)

    if num_cores is None:
        # Best-effort TensorCore count (2 on v7x); only used to pick the grid.
        num_cores = getattr(jax.devices()[0], "num_cores", 1) or 1

    # Transposed ("batch on lanes") presentation -> lane-dense loads/stores.
    s_t = s_prev.T                       # (D, B)
    h_t = h_prev.T                       # (D, B)
    w1_t = w1.T                          # (4D, 2D)
    w2_t = w2.T                          # (D, 4D)
    b1_t = b1.reshape(D4, 1)
    b2_t = b2.reshape(D, 1)
    g_t = gamma.reshape(D, 1)
    beta_t = beta.reshape(D, 1)

    TB = _pick_batch_tile(B, tile_b_max, num_cores)
    grid = (pl.cdiv(B, TB),)             # ragged last block handled by the grid
                                         # (no activation padding / extra HBM pass)

    act_spec = pl.BlockSpec((D, TB), lambda i: (0, i))
    resident = lambda shape: pl.BlockSpec(shape, lambda i: (0, 0))  # stays in VMEM

    out_t = pl.pallas_call(
        transition_kernel,
        out_shape=jax.ShapeDtypeStruct((D, B), jnp.float32),
        grid=grid,
        in_specs=[
            act_spec,                    # s^T tile
            act_spec,                    # h^T tile
            resident((D4, 2 * D)),       # w1^T (resident across the grid)
            resident((D4, 1)),           # b1
            resident((D, D4)),           # w2^T
            resident((D, 1)),            # b2
            resident((D, 1)),            # gamma
            resident((D, 1)),            # beta
        ],
        out_specs=act_spec,
        compiler_params=pltpu.CompilerParams(
            dimension_semantics=("parallel",),
            # vmem_limit_bytes left at default: tiles+weights are a few 100 KiB
            # at D=32.  Set it explicitly if D / tile_b_max are scaled up.
        ),
    )(s_t, h_t, w1_t, b1_t, w2_t, b2_t, g_t, beta_t)

    return out_t.T                       # back to (B, D)


def reference(s_prev, h_prev, w1, b1, w2, b2, gamma, beta):
    x = jnp.concatenate([s_prev, h_prev], axis=-1)
    h = x @ w1 + b1
    h = h * jax.nn.sigmoid(h)
    y = h @ w2 + b2
    mean = jnp.mean(y, axis=-1, keepdims=True)
    var = jnp.mean((y - mean) ** 2, axis=-1, keepdims=True)
    return (y - mean) * jax.lax.rsqrt(var + 1e-5) * gamma + beta


if __name__ == "__main__":
    key = jax.random.PRNGKey(0)
    ks = jax.random.split(key, 6)

    D = 32                               # hidden dim ("dim" in the PyTorch module)
    # nn.Linear(2D,4D), nn.Linear(4D,D), nn.LayerNorm(D) parameters.
    w1 = jax.random.normal(ks[0], (2 * D, 4 * D), jnp.float32) * 0.05
    b1 = jax.random.normal(ks[1], (1, 4 * D), jnp.float32) * 0.01
    w2 = jax.random.normal(ks[2], (4 * D, D), jnp.float32) * 0.05
    b2 = jax.random.normal(ks[3], (1, D), jnp.float32) * 0.01
    gamma = jnp.ones((1, D), jnp.float32)
    beta = jnp.zeros((1, D), jnp.float32)

    fn = jax.jit(transition_net, static_argnames=("tile_b_max", "num_cores"))

    # Case 1: small batch -> single grid step, full-extent (non-128) lane block.
    B = 100
    s_prev = jax.random.normal(ks[4], (B, D), jnp.float32)
    h_prev = jax.random.normal(ks[5], (B, D), jnp.float32)
    out = jax.block_until_ready(fn(s_prev, h_prev, w1, b1, w2, b2, gamma, beta))
    ref = reference(s_prev, h_prev, w1, b1, w2, b2, gamma, beta)
    assert out.shape == (B, D)
    assert jnp.allclose(out, ref, atol=1e-5, rtol=1e-5), \
        float(jnp.max(jnp.abs(out - ref)))

    # Case 2: multi-step ragged grid (TB=128, last block only partially valid),
    # exercising the no-padding path and resident weights across grid steps.
    B2 = 300
    s2 = jax.random.normal(jax.random.PRNGKey(7), (B2, D), jnp.float32)
    h2 = jax.random.normal(jax.random.PRNGKey(8), (B2, D), jnp.float32)
    out2 = jax.block_until_ready(
        fn(s2, h2, w1, b1, w2, b2, gamma, beta, tile_b_max=128, num_cores=1))
    ref2 = reference(s2, h2, w1, b1, w2, b2, gamma, beta)
    assert out2.shape == (B2, D)
    assert jnp.allclose(out2, ref2, atol=1e-5, rtol=1e-5), \
        float(jnp.max(jnp.abs(out2 - ref2)))

    print("KERNEL_OK")
</pallas_src>

<mosaic_0001>
module attributes {stable_mosaic.version = 11 : i64} {
  func.func @transition_kernel(%arg0: i32, %arg1: memref<32x100xf32, #tpu.memory_space<vmem>>, %arg2: memref<32x100xf32, #tpu.memory_space<vmem>>, %arg3: memref<128x64xf32, #tpu.memory_space<vmem>>, %arg4: memref<128x1xf32, #tpu.memory_space<vmem>>, %arg5: memref<32x128xf32, #tpu.memory_space<vmem>>, %arg6: memref<32x1xf32, #tpu.memory_space<vmem>>, %arg7: memref<32x1xf32, #tpu.memory_space<vmem>>, %arg8: memref<32x1xf32, #tpu.memory_space<vmem>>, %arg9: memref<32x100xf32, #tpu.memory_space<vmem>>) attributes {dimension_semantics = [#tpu.dimension_semantics<parallel>], iteration_bounds = array<i64: 1>, scalar_prefetch = 0 : i64, scratch_operands = 0 : i64, tpu.core_type = #tpu.core_type<tc>, window_params = [{transform_indices = @transform_0, window_bounds = array<i64: 32, 100>}, {transform_indices = @transform_1, window_bounds = array<i64: 32, 100>}, {pipeline_mode = #tpu.pipeline_mode<synchronous>, transform_indices = @transform_2, window_bounds = array<i64: 128, 64>}, {pipeline_mode = #tpu.pipeline_mode<synchronous>, transform_indices = @transform_3, window_bounds = array<i64: 128, 1>}, {pipeline_mode = #tpu.pipeline_mode<synchronous>, transform_indices = @transform_4, window_bounds = array<i64: 32, 128>}, {pipeline_mode = #tpu.pipeline_mode<synchronous>, transform_indices = @transform_5, window_bounds = array<i64: 32, 1>}, {pipeline_mode = #tpu.pipeline_mode<synchronous>, transform_indices = @transform_6, window_bounds = array<i64: 32, 1>}, {pipeline_mode = #tpu.pipeline_mode<synchronous>, transform_indices = @transform_7, window_bounds = array<i64: 32, 1>}, {transform_indices = @transform_8, window_bounds = array<i64: 32, 100>}]} {
    %c0 = arith.constant 0 : index
    %c0_0 = arith.constant 0 : index
    %0 = vector.load %arg1[%c0, %c0_0] : memref<32x100xf32, #tpu.memory_space<vmem>>, vector<32x100xf32>
    %c0_1 = arith.constant 0 : index
    %c0_2 = arith.constant 0 : index
    %1 = vector.load %arg2[%c0_1, %c0_2] : memref<32x100xf32, #tpu.memory_space<vmem>>, vector<32x100xf32>
    %2 = tpu.concatenate %0, %1 in 0 : vector<32x100xf32>, vector<32x100xf32> -> vector<64x100xf32>
    %c0_3 = arith.constant 0 : index
    %c0_4 = arith.constant 0 : index
    %3 = vector.load %arg3[%c0_3, %c0_4] : memref<128x64xf32, #tpu.memory_space<vmem>>, vector<128x64xf32>
    %cst = arith.constant dense<0.000000e+00> : vector<128x100xf32>
    %4 = tpu.matmul %3, %2, %cst {dimension_numbers = #tpu.dot_dimension_numbers<[1], [0], [0], [1], [0, 0, 1, 1], [], []>} : vector<128x64xf32>, vector<64x100xf32>, vector<128x100xf32> -> vector<128x100xf32>
    %c0_5 = arith.constant 0 : index
    %c0_6 = arith.constant 0 : index
    %5 = vector.load %arg4[%c0_5, %c0_6] : memref<128x1xf32, #tpu.memory_space<vmem>>, vector<128x1xf32>
    %6 = vector.broadcast %5 : vector<128x1xf32> to vector<128x100xf32>
    %7 = arith.addf %4, %6 : vector<128x100xf32>
    %cst_7 = arith.constant 5.000000e-01 : f32
    %8 = vector.broadcast %cst_7 : f32 to vector<128x100xf32>
    %9 = arith.mulf %8, %7 : vector<128x100xf32>
    %cst_8 = arith.constant 5.000000e-01 : f32
    %10 = vector.broadcast %cst_8 : f32 to vector<128x100xf32>
    %11 = arith.mulf %10, %7 : vector<128x100xf32>
    %12 = math.tanh %11 : vector<128x100xf32>
    %cst_9 = arith.constant 1.000000e+00 : f32
    %13 = vector.broadcast %cst_9 : f32 to vector<128x100xf32>
    %14 = arith.addf %13, %12 : vector<128x100xf32>
    %15 = arith.mulf %9, %14 : vector<128x100xf32>
    %c0_10 = arith.constant 0 : index
    %c0_11 = arith.constant 0 : index
    %16 = vector.load %arg5[%c0_10, %c0_11] : memref<32x128xf32, #tpu.memory_space<vmem>>, vector<32x128xf32>
    %cst_12 = arith.constant dense<0.000000e+00> : vector<32x100xf32>
    %17 = tpu.matmul %16, %15, %cst_12 {dimension_numbers = #tpu.dot_dimension_numbers<[1], [0], [0], [1], [0, 0, 1, 1], [], []>} : vector<32x128xf32>, vector<128x100xf32>, vector<32x100xf32> -> vector<32x100xf32>
    %c0_13 = arith.constant 0 : index
    %c0_14 = arith.constant 0 : index
    %18 = vector.load %arg6[%c0_13, %c0_14] : memref<32x1xf32, #tpu.memory_space<vmem>>, vector<32x1xf32>
    %19 = vector.broadcast %18 : vector<32x1xf32> to vector<32x100xf32>
    %20 = arith.addf %17, %19 : vector<32x100xf32>
    %cst_15 = arith.constant dense<0.000000e+00> : vector<100xf32>
    %21 = vector.multi_reduction <add>, %20, %cst_15 [0] : vector<32x100xf32> to vector<100xf32>
    %22 = vector.shape_cast %21 : vector<100xf32> to vector<1x100xf32>
    %cst_16 = arith.constant 3.200000e+01 : f32
    %23 = vector.broadcast %cst_16 : f32 to vector<1x100xf32>
    %24 = arith.divf %22, %23 : vector<1x100xf32>
    %25 = vector.broadcast %24 : vector<1x100xf32> to vector<32x100xf32>
    %26 = arith.subf %20, %25 : vector<32x100xf32>
    %27 = arith.mulf %26, %26 : vector<32x100xf32>
    %cst_17 = arith.constant dense<0.000000e+00> : vector<100xf32>
    %28 = vector.multi_reduction <add>, %27, %cst_17 [0] : vector<32x100xf32> to vector<100xf32>
    %29 = vector.shape_cast %28 : vector<100xf32> to vector<1x100xf32>
    %cst_18 = arith.constant 3.200000e+01 : f32
    %30 = vector.broadcast %cst_18 : f32 to vector<1x100xf32>
    %31 = arith.divf %29, %30 : vector<1x100xf32>
    %cst_19 = arith.constant 9.99999974E-6 : f32
    %32 = vector.broadcast %cst_19 : f32 to vector<1x100xf32>
    %33 = arith.addf %31, %32 : vector<1x100xf32>
    %34 = math.rsqrt %33 : vector<1x100xf32>
    %35 = vector.broadcast %34 : vector<1x100xf32> to vector<32x100xf32>
    %36 = arith.mulf %26, %35 : vector<32x100xf32>
    %c0_20 = arith.constant 0 : index
    %c0_21 = arith.constant 0 : index
    %37 = vector.load %arg7[%c0_20, %c0_21] : memref<32x1xf32, #tpu.memory_space<vmem>>, vector<32x1xf32>
    %38 = vector.broadcast %37 : vector<32x1xf32> to vector<32x100xf32>
    %39 = arith.mulf %36, %38 : vector<32x100xf32>
    %c0_22 = arith.constant 0 : index
    %c0_23 = arith.constant 0 : index
    %40 = vector.load %arg8[%c0_22, %c0_23] : memref<32x1xf32, #tpu.memory_space<vmem>>, vector<32x1xf32>
    %41 = vector.broadcast %40 : vector<32x1xf32> to vector<32x100xf32>
    %42 = arith.addf %39, %41 : vector<32x100xf32>
    %c0_24 = arith.constant 0 : index
    %c0_25 = arith.constant 0 : index
    %43 = vector.load %arg9[%c0_24, %c0_25] : memref<32x100xf32, #tpu.memory_space<vmem>>, vector<32x100xf32>
    tpu.vector_store %arg9[%c0_24, %c0_25], %42 {strides = array<i32>} : memref<32x100xf32, #tpu.memory_space<vmem>>, vector<32x100xf32>,
    return
  }
  func.func @transform_0(%arg0: i32) -> (i32, i32) {
    %c0_i32 = arith.constant 0 : i32
    %c0_i32_0 = arith.constant 0 : i32
    return %c0_i32, %arg0 : i32, i32
  }
  func.func @transform_1(%arg0: i32) -> (i32, i32) {
    %c0_i32 = arith.constant 0 : i32
    %c0_i32_0 = arith.constant 0 : i32
    return %c0_i32, %arg0 : i32, i32
  }
  func.func @transform_2(%arg0: i32) -> (i32, i32) {
    %c0_i32 = arith.constant 0 : i32
    %c0_i32_0 = arith.constant 0 : i32
    %c0_i32_1 = arith.constant 0 : i32
    return %c0_i32, %c0_i32_0 : i32, i32
  }
  func.func @transform_3(%arg0: i32) -> (i32, i32) {
    %c0_i32 = arith.constant 0 : i32
    %c0_i32_0 = arith.constant 0 : i32
    %c0_i32_1 = arith.constant 0 : i32
    return %c0_i32, %c0_i32_0 : i32, i32
  }
  func.func @transform_4(%arg0: i32) -> (i32, i32) {
    %c0_i32 = arith.constant 0 : i32
    %c0_i32_0 = arith.constant 0 : i32
    %c0_i32_1 = arith.constant 0 : i32
    return %c0_i32, %c0_i32_0 : i32, i32
  }
  func.func @transform_5(%arg0: i32) -> (i32, i32) {
    %c0_i32 = arith.constant 0 : i32
    %c0_i32_0 = arith.constant 0 : i32
    %c0_i32_1 = arith.constant 0 : i32
    return %c0_i32, %c0_i32_0 : i32, i32
  }
  func.func @transform_6(%arg0: i32) -> (i32, i32) {
    %c0_i32 = arith.constant 0 : i32
    %c0_i32_0 = arith.constant 0 : i32
    %c0_i32_1 = arith.constant 0 : i32
    return %c0_i32, %c0_i32_0 : i32, i32
  }
  func.func @transform_7(%arg0: i32) -> (i32, i32) {
    %c0_i32 = arith.constant 0 : i32
    %c0_i32_0 = arith.constant 0 : i32
    %c0_i32_1 = arith.constant 0 : i32
    return %c0_i32, %c0_i32_0 : i32, i32
  }
  func.func @transform_8(%arg0: i32) -> (i32, i32) {
    %c0_i32 = arith.constant 0 : i32
    %c0_i32_0 = arith.constant 0 : i32
    return %c0_i32, %arg0 : i32, i32
  }
}

</mosaic_0001>

<bundles_post_ra>
// kernel: transition_net.1
= control target key start
LH: loop header
LB: loop body
LE: loop exit
PB: predicated region body
PF: predicated region fallthrough
CT: control target
= control target key end

     0   :  { %vm150_vm0 = vcmask 523264   ;;  %v891_v5 = vmov 0   ;;  %s1156_s0 = inlined_call_operand.vmem [shape: f32[32,100], index: 0, kind: input, shape index: {}]   ;;  %s1157_s1 = inlined_call_operand.vmem [shape: f32[32,100], index: 1, kind: input, shape index: {}]   ;;  %s1158_s2 = inlined_call_operand.vmem [shape: f32[128,64], index: 2, kind: input, shape index: {}]   ;;  %s1159_s3 = inlined_call_operand.vmem [shape: f32[128,1], index: 3, kind: input, shape index: {}]   ;;  %s1160_s4 = inlined_call_operand.vmem [shape: f32[32,128], index: 4, kind: input, shape index: {}]   ;;  %s1161_s5 = inlined_call_operand.vmem [shape: f32[32,1], index: 5, kind: input, shape index: {}]   ;;  %s1162_s6 = inlined_call_operand.vmem [shape: f32[32,1], index: 6, kind: input, shape index: {}]   ;;  %s1163_s7 = inlined_call_operand.vmem [shape: f32[32,1], index: 7, kind: input, shape index: {}]   ;;  %s1164_s8 = inlined_call_operand.hbm [shape: f32[32,100], index: 8, kind: output, shape index: {}]  }
   0x1   :  { %v30_v0 = vld [vmem:[%s1156_s0] sm:$0xff]  ;;  %v31_v1 = vld [vmem:[%s1156_s0 + $0x8] sm:$0xff]  ;;  %v32_v2 = vld [vmem:[%s1156_s0 + $0x10] sm:$0xff]  ;;  %831 = vset.pattern.permute.xlu0 %v891_v5  ;;  %832 = vset.pattern.permute.xlu1 %v891_v5 }
   0x2   :  { %v779_v3 = vpack.c.bf16 %v31_v1, %v30_v0  ;;  %v33_v4 = vld [vmem:[%s1156_s0 + $0x18] sm:$0xff]  ;;  %v34_v7 = vld [vmem:[%s1157_s1] sm:$0xff]  ;;  %v35_v8 = vld [vmem:[%s1157_s1 + $0x8] sm:$0xff] }
   0x3   :  { %v783_v6 = vpack.c.bf16 %v33_v4, %v32_v2  ;;  %v38_v9 = vld [vmem:[%s1158_s2] sm:$0xff]  ;;  %v787_v10 = vpack.c.bf16 %v35_v8, %v34_v7  ;;  %v36_v11 = vld [vmem:[%s1157_s1 + $0x10] sm:$0xff]  ;;  %v37_v12 = vld [vmem:[%s1157_s1 + $0x18] sm:$0xff] }
   0x4   :  { %780 = vmatprep.subr.bf16.mxu0 %v779_v3  ;;  %717 = vmatprep.mubr.msk.f32.mxu0 %vm150_vm0, %v38_v9  ;;  %v54_v13 = vld [vmem:[%s1159_s3] sm:$0xff]  ;;  %v56_v14 = vld [vmem:[%s1159_s3 + $0x10] sm:$0xff]  ;;  %v791_v15 = vpack.c.bf16 %v37_v12, %v36_v11  ;;  %v55_v16 = vld [vmem:[%s1159_s3 + $0x8] sm:$0xff] }
   0x5   :  { %782 = vmatpush3.bf16.msra.mxu0 %v779_v3  ;;  %72 = vperm.xlu0 %831, %v54_v13   ;;  %v57_v17 = vld [vmem:[%s1159_s3 + $0x18] sm:$0xff]  ;;  %v58_v18 = vld [vmem:[%s1159_s3 + $0x20] sm:$0xff]  ;;  %v59_v19 = vld [vmem:[%s1159_s3 + $0x28] sm:$0xff] }
   0x6   :  { %784 = vmatprep.subr.bf16.mxu0 %v783_v6  ;;  %82 = vperm.xlu1 %832, %v56_v14   ;;  %v39_v20 = vld [vmem:[%s1158_s2 + $0x8] sm:$0xff]  ;;  %v40_v21 = vld [vmem:[%s1158_s2 + $0x10] sm:$0xff] }
   0x9   :  { %786 = vmatpush3.bf16.msra.mxu0 %v783_v6  ;;  %77 = vperm.xlu0 %831, %v55_v16  }
   0xa   :  { %788 = vmatprep.subr.bf16.mxu0 %v787_v10  ;;  %87 = vperm.xlu1 %832, %v57_v17  }
   0xd   :  { %790 = vmatpush3.bf16.msra.mxu0 %v787_v10  ;;  %92 = vperm.xlu0 %831, %v58_v18  }
   0xe   :  { %792 = vmatprep.subr.bf16.mxu0 %v791_v15 }
  0x11   :  { %794 = vmatpush3.bf16.msra.mxu0 %v791_v15 }
  0x12   :  { %13 = vsyncpa [#allocation3], 0  ;;  %97 = vperm.xlu1 %832, %v59_v19   ;;  %v60_v22 = vld [vmem:[%s1159_s3 + $0x30] sm:$0xff]  ;;  %v61_v23 = vld [vmem:[%s1159_s3 + $0x38] sm:$0xff]  ;;  %vm521_vm1 = vcmask 818176  }
  0x13   :  { %v41_v24 = vld [vmem:[%s1158_s2 + $0x18] sm:$0xff]  ;;  %v42_v25 = vld [vmem:[%s1158_s2 + $0x20] sm:$0xff]  ;;  %102 = vperm.xlu0 %831, %v60_v22   ;;  %v63_v27 = vld [vmem:[%s1159_s3 + $0x48] sm:$0xff] }
  0x14   :  { %718 = vmatmul.mubr.msk.f32.vlgmr.msra.gmra.mrb[0].mxu0 %vm150_vm0, %v39_v20  ;;  %v62_v26 = vld [vmem:[%s1159_s3 + $0x40] sm:$0xff]  ;;  %v43_v28 = vld [vmem:[%s1158_s2 + $0x28] sm:$0xff]  ;;  %v44_v29 = vld [vmem:[%s1158_s2 + $0x30] sm:$0xff] }
  0x15   :  { %720 = vmatprep.mubr.msk.f32.mxu0 %vm150_vm0, %v40_v21  ;;  %v64_v30 = vld [vmem:[%s1159_s3 + $0x50] sm:$0xff]  ;;  %v65_v31 = vld [vmem:[%s1159_s3 + $0x58] sm:$0xff]  ;;  %v46_v33 = vld [vmem:[%s1158_s2 + $0x40] sm:$0xff] }
  0x16   :  { %107 = vperm.xlu1 %832, %v61_v23   ;;  %v45_v32 = vld [vmem:[%s1158_s2 + $0x38] sm:$0xff]  ;;  %v66_v34 = vld [vmem:[%s1159_s3 + $0x60] sm:$0xff]  ;;  %v67_v35 = vld [vmem:[%s1159_s3 + $0x68] sm:$0xff] }
  0x17   :  { %112 = vperm.xlu0 %831, %v62_v26   ;;  %v47_v36 = vld [vmem:[%s1158_s2 + $0x48] sm:$0xff]  ;;  %v48_v37 = vld [vmem:[%s1158_s2 + $0x50] sm:$0xff]  ;;  %v69_v39 = vld [vmem:[%s1159_s3 + $0x78] sm:$0xff] }
  0x18   :  { %721 = vmatmul.mubr.msk.f32.gmra.mrb[2].mxu0 %vm150_vm0, %v41_v24  ;;  %v68_v38 = vld [vmem:[%s1159_s3 + $0x70] sm:$0xff]  ;;  %v49_v40 = vld [vmem:[%s1158_s2 + $0x58] sm:$0xff]  ;;  %v50_v41 = vld [vmem:[%s1158_s2 + $0x60] sm:$0xff] }
  0x19   :  { %723 = vmatprep.mubr.msk.f32.mxu0 %vm150_vm0, %v42_v25  ;;  %v412_v42 = vld [vmem:[%s1161_s5] sm:$0xff]  ;;  %v413_v43 = vld [vmem:[%s1161_s5 + $0x8] sm:$0xff]  ;;  %v52_v45 = vld [vmem:[%s1158_s2 + $0x70] sm:$0xff] }
  0x1a   :  { %117 = vperm.xlu1 %832, %v63_v27   ;;  %v51_v44 = vld [vmem:[%s1158_s2 + $0x68] sm:$0xff]  ;;  %v414_v46 = vld [vmem:[%s1161_s5 + $0x10] sm:$0xff]  ;;  %v415_v47 = vld [vmem:[%s1161_s5 + $0x18] sm:$0xff] }
  0x1b   :  { %122 = vperm.xlu0 %831, %v64_v30   ;;  %v53_v48 = vld [vmem:[%s1158_s2 + $0x78] sm:$0xff]  ;;  %v565_v49 = vld [vmem:[%s1162_s6] sm:$0xff]  ;;  %v566_v50 = vld [vmem:[%s1162_s6 + $0x8] sm:$0xff] }
  0x1c   :  { %724 = vmatmul.mubr.msk.f32.gmra.mrb[4].mxu0 %vm150_vm0, %v43_v28  ;;  %v567_v51 = vld [vmem:[%s1162_s6 + $0x10] sm:$0xff]  ;;  %v568_v52 = vld [vmem:[%s1162_s6 + $0x18] sm:$0xff]  ;;  %v593_v53 = vld [vmem:[%s1163_s7] sm:$0xff] }
  0x1d   :  { %726 = vmatprep.mubr.msk.f32.mxu0 %vm150_vm0, %v44_v29  ;;  %v594_v54 = vld [vmem:[%s1163_s7 + $0x8] sm:$0xff]  ;;  %v595_v55 = vld [vmem:[%s1163_s7 + $0x10] sm:$0xff]  ;;  %v596_v56 = vld [vmem:[%s1163_s7 + $0x18] sm:$0xff] }
  0x1e   :  { %127 = vperm.xlu1 %832, %v65_v31   ;;  %v408_v57 = vld [vmem:[%s1160_s4] sm:$0xff] }
  0x1f   :  { %132 = vperm.xlu0 %831, %v66_v34   ;;  %773 = vmatprep.mubr.f32.mxu1 %v408_v57 }
  0x20   :  { %727 = vmatmul.mubr.msk.f32.gmra.mrb[6].mxu0 %vm150_vm0, %v45_v32 }
  0x21   :  { %729 = vmatprep.mubr.msk.f32.mxu0 %vm150_vm0, %v46_v33 }
  0x22   :  { %137 = vperm.xlu1 %832, %v67_v35  }
  0x23   :  { %142 = vperm.xlu0 %831, %v68_v38  }
  0x24   :  { %730 = vmatmul.mubr.msk.f32.gmra.mrb[8].mxu0 %vm150_vm0, %v47_v36 }
  0x25   :  { %732 = vmatprep.mubr.msk.f32.mxu0 %vm150_vm0, %v48_v37 }
  0x26   :  { %147 = vperm.xlu1 %832, %v69_v39  }
  0x27   :  { %418 = vperm.xlu0 %831, %v412_v42  }
  0x28   :  { %733 = vmatmul.mubr.msk.f32.gmra.mrb[10].mxu0 %vm150_vm0, %v49_v40 }
  0x29   :  { %735 = vmatprep.mubr.msk.f32.mxu0 %vm150_vm0, %v50_v41 }
  0x2a   :  { %423 = vperm.xlu1 %832, %v413_v43  }
  0x2b   :  { %428 = vperm.xlu0 %831, %v414_v46  }
  0x2c   :  { %736 = vmatmul.mubr.msk.f32.gmra.mrb[12].mxu0 %vm150_vm0, %v51_v44 }
  0x2d   :  { %738 = vmatprep.mubr.msk.f32.mxu0 %vm150_vm0, %v52_v45 }
  0x2e   :  { %433 = vperm.xlu1 %832, %v415_v47  }
  0x2f   :  { %571 = vperm.xlu0 %831, %v565_v49  }
  0x30   :  { %739 = vmatmul.mubr.msk.f32.gmra.mrb[14].mxu0 %vm150_vm0, %v53_v48 }
  0x32   :  { %576 = vperm.xlu1 %832, %v566_v50  }
  0x33   :  { %581 = vperm.xlu0 %831, %v567_v51  }
  0x36   :  { %586 = vperm.xlu1 %832, %v568_v52  }
  0x37   :  { %599 = vperm.xlu0 %831, %v593_v53  }
  0x3a   :  { %604 = vperm.xlu1 %832, %v594_v54  }
  0x3b   :  { %609 = vperm.xlu0 %831, %v595_v55  }
  0x3e   :  { %614 = vperm.xlu1 %832, %v596_v56  }
  0x84   :  { %v73_v59 = vpop.permute.xlu0 %72 }
  0x85   :  { %v83_v58 = vpop.permute.xlu1 %82 }
  0x88   :  { %v78_v61 = vpop.permute.xlu0 %77 }
  0x89   :  { %v88_v60 = vpop.permute.xlu1 %87 }
  0x8c   :  { %v93_v63 = vpop.permute.xlu0 %92 }
  0x91   :  { %v98_v62 = vpop.permute.xlu1 %97 }
  0x92   :  { %v103_v8 = vpop.permute.xlu0 %102 }
  0x95   :  { %v108_v5 = vpop.permute.xlu1 %107 }
  0x96   :  { %v113_v19 = vpop.permute.xlu0 %112 }
  0x99   :  { %v118_v17 = vpop.permute.xlu1 %117 }
  0x9a   :  { %v123_v33 = vpop.permute.xlu0 %122 }
  0x9d   :  { %v128_v29 = vpop.permute.xlu1 %127 }
  0x9e   :  { %v133_v54 = vpop.permute.xlu0 %132 }
  0xa1   :  { %v138_v50 = vpop.permute.xlu1 %137 }
  0xe7   :  { %v719_v0 = vpop.f32.mrb[0].mxu0 }
  0xe8   :  { %v271_v1 = vadd.f32 %v719_v0, %v78_v61  ;;  %v265_v2 = vpop.f32.mrb[1].mxu0 }
  0xe9   :  { %v266_v3 = vadd.f32 %v265_v2, %v73_v59 }
  0xea   :  { %v345_v4 = vmul.f32 0.5, %v271_v1 }
  0xeb   :  { %v344_v6 = vmul.f32 0.5, %v266_v3  ;;  %v722_v7 = vpop.f32.mrb[2].mxu0 }
  0xec   :  { %833 = vtanh.f32 %v345_v4  ;;  %v281_v9 = vadd.f32 %v722_v7, %v88_v60  ;;  %v275_v10 = vpop.f32.mrb[3].mxu0  ;;  %v148_v7 = vpop.permute.xlu1 %147 }
  0xed   :  { %835 = vtanh.f32 %v344_v6  ;;  %v276_v11 = vadd.f32 %v275_v10, %v83_v58 }
  0xee   :  { %v347_v12 = vmul.f32 0.5, %v281_v9 }
  0xef   :  { %v346_v13 = vmul.f32 0.5, %v276_v11  ;;  %v725_v14 = vpop.f32.mrb[4].mxu0  ;;  %v143_v11 = vpop.permute.xlu0 %142 }
  0xf0   :  { %837 = vtanh.f32 %v347_v12  ;;  %v291_v15 = vadd.f32 %v725_v14, %v98_v62  ;;  %v285_v16 = vpop.f32.mrb[5].mxu0 }
  0xf1   :  { %839 = vtanh.f32 %v346_v13  ;;  %v286_v18 = vadd.f32 %v285_v16, %v93_v63 }
  0xf2   :  { %v349_v20 = vmul.f32 0.5, %v291_v15 }
  0xf3   :  { %v348_v21 = vmul.f32 0.5, %v286_v18  ;;  %v728_v22 = vpop.f32.mrb[6].mxu0 }
  0xf4   :  { %841 = vtanh.f32 %v349_v20  ;;  %v301_v23 = vadd.f32 %v728_v22, %v108_v5  ;;  %v295_v24 = vpop.f32.mrb[7].mxu0 }
  0xf5   :  { %843 = vtanh.f32 %v348_v21  ;;  %v296_v25 = vadd.f32 %v295_v24, %v103_v8 }
  0xf6   :  { %v834_v26 = vpop.eup %833  ;;  %v1115_v27 = vmul.f32 0.5, %v301_v23 }
  0xf7   :  { %v836_v28 = vpop.eup %835  ;;  %v377_v30 = vadd.f32 1.0, %v834_v26  ;;  %v1117_v31 = vmul.f32 0.5, %v296_v25  ;;  %v731_v32 = vpop.f32.mrb[8].mxu0 }
  0xf8   :  { %v376_v34 = vadd.f32 1.0, %v836_v28  ;;  %845 = vtanh.f32 %v1115_v27  ;;  %v311_v35 = vadd.f32 %v731_v32, %v118_v17  ;;  %v305_v36 = vpop.f32.mrb[9].mxu0 }
  0xf9   :  { %v393_v37 = vmul.f32 %v377_v30, %v345_v4  ;;  %847 = vtanh.f32 %v1117_v31  ;;  %v306_v38 = vadd.f32 %v305_v36, %v113_v19 }
  0xfa   :  { %v838_v39 = vpop.eup %837  ;;  %v392_v40 = vmul.f32 %v376_v34, %v344_v6  ;;  %v353_v41 = vmul.f32 0.5, %v311_v35 }
  0xfb   :  { %v840_v42 = vpop.eup %839  ;;  %v379_v43 = vadd.f32 1.0, %v838_v39  ;;  %v352_v44 = vmul.f32 0.5, %v306_v38  ;;  %v734_v45 = vpop.f32.mrb[10].mxu0 }
  0xfc   :  { %v378_v46 = vadd.f32 1.0, %v840_v42  ;;  %849 = vtanh.f32 %v353_v41  ;;  %v321_v47 = vadd.f32 %v734_v45, %v128_v29  ;;  %v315_v48 = vpop.f32.mrb[11].mxu0  ;;  %v795_v49 = vpack.c.bf16 %v393_v37, %v392_v40 }
  0xfd   :  { %v395_v51 = vmul.f32 %v379_v43, %v347_v12  ;;  %851 = vtanh.f32 %v352_v44  ;;  %v316_v52 = vadd.f32 %v315_v48, %v123_v33 }
  0xfe   :  { %v842_v53 = vpop.eup %841  ;;  %v394_v55 = vmul.f32 %v378_v46, %v346_v13  ;;  %v355_v56 = vmul.f32 0.5, %v321_v47  ;;  %796 = vmatprep.subr.bf16.mxu1 %v795_v49 }
  0xff   :  { %v844_v57 = vpop.eup %843  ;;  %v381_v58 = vadd.f32 1.0, %v842_v53  ;;  %v354_v59 = vmul.f32 0.5, %v316_v52  ;;  %v737_v60 = vpop.f32.mrb[12].mxu0  ;;  %798 = vmatpush3.bf16.msra.mxu1 %v795_v49  ;;  %v411_v52 = vld [vmem:[%s1160_s4 + $0x18] sm:$0xff] }
 0x100   :  { %v380_v61 = vadd.f32 1.0, %v844_v57  ;;  %853 = vtanh.f32 %v355_v56  ;;  %v331_v62 = vadd.f32 %v737_v60, %v138_v50  ;;  %v325_v63 = vpop.f32.mrb[13].mxu0  ;;  %v799_v0 = vpack.c.bf16 %v395_v51, %v394_v55  ;;  %v409_v50 = vld [vmem:[%s1160_s4 + $0x8] sm:$0xff]  ;;  %v410_v51 = vld [vmem:[%s1160_s4 + $0x10] sm:$0xff]  ;;  %v419_v53 = vpop.permute.xlu0 %418  ;;  %s892_s4 = smov [#allocation2]  }
 0x101   :  { %v397_v1 = vmul.f32 %v381_v58, %v349_v20  ;;  %855 = vtanh.f32 %v354_v59  ;;  %v326_v2 = vadd.f32 %v325_v63, %v133_v54  ;;  %v424_v54 = vpop.permute.xlu1 %423  ;;  %s630_s15 = sshll.u32 %s892_s4, 4  ;;  %s631_s15 = int_to_ptr.vmem [resolvable:$true] %s630_s15 }
 0x102   :  { %v846_v3 = vpop.eup %845  ;;  %v396_v4 = vmul.f32 %v380_v61, %v348_v21  ;;  %v357_v5 = vmul.f32 0.5, %v331_v62  ;;  %800 = vmatprep.subr.bf16.mxu1 %v799_v0  ;;  %s867_s16 = scalar_lea.vmem %s631_s15, 512  ;;  %p872_p1 = scmp.lt.s32.totalorder %s631_s15, %s631_s15 }
 0x103   :  { %v848_v6 = vpop.eup %847  ;;  %v383_v8 = vadd.f32 1.0, %v846_v3  ;;  %v356_v9 = vmul.f32 0.5, %v326_v2  ;;  %v740_v10 = vpop.f32.mrb[14].mxu0  ;;  %802 = vmatpush3.bf16.msra.mxu1 %v799_v0  ;;  %p868_p0 = scmp.ne.s32.totalorder %s631_s15, %s867_s16  ;;  %p873_p2 = scmp.lt.s32.totalorder %s867_s16, %s867_s16 }
 0x104   :  { %v382_v12 = vadd.f32 1.0, %v848_v6  ;;  %857 = vtanh.f32 %v357_v5  ;;  %v341_v13 = vadd.f32 %v740_v10, %v148_v7  ;;  %v335_v14 = vpop.f32.mrb[15].mxu0  ;;  %v803_v15 = vpack.c.bf16 %v397_v1, %v396_v4  ;;  %v429_v60 = vpop.permute.xlu0 %428 }
 0x105   :  { %v399_v16 = vmul.f32 %v383_v8, %v1115_v27  ;;  %859 = vtanh.f32 %v356_v9  ;;  %v336_v17 = vadd.f32 %v335_v14, %v143_v11  ;;  %v434_v63 = vpop.permute.xlu1 %433  ;;  %p874_p3 = por %p873_p2, %p872_p1 }
 0x106   :  { %v850_v18 = vpop.eup %849  ;;  %v398_v19 = vmul.f32 %v382_v12, %v1117_v31  ;;  %v359_v20 = vmul.f32 0.5, %v341_v13  ;;  %804 = vmatprep.subr.bf16.mxu1 %v803_v15 }
 0x107   :  { %v852_v21 = vpop.eup %851  ;;  %v385_v22 = vadd.f32 1.0, %v850_v18  ;;  %v358_v23 = vmul.f32 0.5, %v336_v17  ;;  %806 = vmatpush3.bf16.msra.mxu1 %v803_v15  ;;  %p875_p4 = pnand %p874_p3, %p868_p0 }
 0x108   :  { %v384_v24 = vadd.f32 1.0, %v852_v21  ;;  %861 = vtanh.f32 %v359_v20  ;;  %v807_v25 = vpack.c.bf16 %v399_v16, %v398_v19 }
 0x109   :  { %v401_v26 = vmul.f32 %v385_v22, %v353_v41  ;;  %863 = vtanh.f32 %v358_v23 }
 0x10a   :  { %v854_v28 = vpop.eup %853  ;;  %v400_v29 = vmul.f32 %v384_v24, %v352_v44  ;;  %808 = vmatprep.subr.bf16.mxu1 %v807_v25 }
 0x10b   :  { %v856_v27 = vpop.eup %855  ;;  %v387_v30 = vadd.f32 1.0, %v854_v28  ;;  %810 = vmatpush3.bf16.msra.mxu1 %v807_v25 }
 0x10c   :  { %v386_v32 = vadd.f32 1.0, %v856_v27  ;;  %v811_v33 = vpack.c.bf16 %v401_v26, %v400_v29 }
 0x10d   :  { %v403_v31 = vmul.f32 %v387_v30, %v355_v56 }
 0x10e   :  { %v858_v34 = vpop.eup %857  ;;  %v402_v35 = vmul.f32 %v386_v32, %v354_v59  ;;  %812 = vmatprep.subr.bf16.mxu1 %v811_v33 }
 0x10f   :  { %v860_v36 = vpop.eup %859  ;;  %v389_v37 = vadd.f32 1.0, %v858_v34  ;;  %814 = vmatpush3.bf16.msra.mxu1 %v811_v33 }
 0x110   :  { %v388_v38 = vadd.f32 1.0, %v860_v36  ;;  %v815_v39 = vpack.c.bf16 %v403_v31, %v402_v35  ;;  %v572_v36 = vpop.permute.xlu0 %571 }
 0x111   :  { %v405_v40 = vmul.f32 %v389_v37, %v357_v5  ;;  %v577_v37 = vpop.permute.xlu1 %576 }
 0x112   :  { %v862_v41 = vpop.eup %861  ;;  %v404_v42 = vmul.f32 %v388_v38, %v356_v9  ;;  %816 = vmatprep.subr.bf16.mxu1 %v815_v39 }
 0x113   :  { %v864_v43 = vpop.eup %863  ;;  %v391_v44 = vadd.f32 1.0, %v862_v41  ;;  %818 = vmatpush3.bf16.msra.mxu1 %v815_v39 }
 0x114   :  { %v390_v45 = vadd.f32 1.0, %v864_v43  ;;  %v819_v46 = vpack.c.bf16 %v405_v40, %v404_v42  ;;  %v582_v40 = vpop.permute.xlu0 %581 }
 0x115   :  { %v407_v47 = vmul.f32 %v391_v44, %v359_v20  ;;  %v587_v41 = vpop.permute.xlu1 %586 }
 0x116   :  { %v406_v48 = vmul.f32 %v390_v45, %v358_v23  ;;  %820 = vmatprep.subr.bf16.mxu1 %v819_v46 }
 0x117   :  { %822 = vmatpush3.bf16.msra.mxu1 %v819_v46 }
 0x118   :  { %v823_v49 = vpack.c.bf16 %v407_v47, %v406_v48  ;;  %v600_v42 = vpop.permute.xlu0 %599 }
 0x119   :  { %v605_v43 = vpop.permute.xlu1 %604 }
 0x11a   :  { %824 = vmatprep.subr.bf16.mxu1 %v823_v49 }
 0x11b   :  { %826 = vmatpush3.bf16.msra.mxu1 %v823_v49 }
 0x11e   :  { %774 = vmatmul.mubr.f32.vlgmr.msra.gmra.mrb[0].mxu1 %v409_v50 }
 0x11f   :  { %776 = vmatprep.mubr.f32.mxu1 %v410_v51 }
 0x122   :  { %777 = vmatmul.mubr.f32.gmra.mrb[2].mxu1 %v411_v52 }
 0x1f1   :  { %v775_v55 = vpop.f32.mrb[0].mxu1 }
 0x1f2   :  { %v508_v56 = vadd.f32 %v775_v55, %v424_v54  ;;  %v502_v57 = vpop.f32.mrb[1].mxu1  ;;  %v615_v54 = vpop.permute.xlu1 %614 }
 0x1f3   :  { %v503_v58 = vadd.f32 %v502_v57, %v419_v53  ;;  %v610_v53 = vpop.permute.xlu0 %609 }
 0x1f4   :  { %v523_v59 = vsel %vm521_vm1, %v508_v56, 0.0 }
 0x1f5   :  { %v522_v61 = vsel %vm521_vm1, %v503_v58, 0.0  ;;  %v778_v62 = vpop.f32.mrb[2].mxu1 }
 0x1f6   :  { %v524_v0 = vadd.f32 %v523_v59, %v522_v61  ;;  %v512_v1 = vpop.f32.mrb[3].mxu1  ;;  %v518_v2 = vadd.f32 %v778_v62, %v434_v63 }
 0x1f7   :  { %v513_v3 = vadd.f32 %v512_v1, %v429_v60 }
 0x1f8   :  { %v527_v6 = vsel %vm521_vm1, %v518_v2, 0.0 }
 0x1f9   :  { %v525_v4 = vsel %vm521_vm1, %v513_v3, 0.0 }
 0x1fa   :  { %v526_v5 = vadd.f32 %v525_v4, %v524_v0 }
 0x1fc   :  { %v528_v7 = vadd.f32 %v527_v6, %v526_v5 }
 0x1fe   :  { %v529_v8 = vrot.slane %v528_v7, 4 }
 0x200   :  { %v530_v9 = vadd.f32 %v529_v8, %v528_v7 }
 0x202   :  { %v531_v10 = vrot.slane %v530_v9, 2 }
 0x204   :  { %v532_v11 = vadd.f32 %v531_v10, %v530_v9 }
 0x206   :  { %v533_v12 = vrot.slane %v532_v11, 1 }
 0x208   :  { %v534_v13 = vadd.f32 %v533_v12, %v532_v11 }
 0x20a   :  { %v536_v14 = vmul.f32 0.03125, %v534_v13 }
 0x20c   :  { %v537_v15 = vsub.f32 %v503_v58, %v536_v14  ;;  %v538_v16 = vsub.f32 %v508_v56, %v536_v14  ;;  %v539_v17 = vsub.f32 %v513_v3, %v536_v14  ;;  %v540_v18 = vsub.f32 %v518_v2, %v536_v14 }
 0x20e   :  { %v541_v19 = vmul.f32 %v537_v15, %v537_v15  ;;  %v542_v20 = vmul.f32 %v538_v16, %v538_v16  ;;  %v543_v21 = vmul.f32 %v539_v17, %v539_v17  ;;  %v544_v22 = vmul.f32 %v540_v18, %v540_v18 }
 0x210   :  { %v545_v23 = vsel %vm521_vm1, %v541_v19, 0.0  ;;  %v546_v24 = vsel %vm521_vm1, %v542_v20, 0.0  ;;  %v548_v26 = vsel %vm521_vm1, %v543_v21, 0.0  ;;  %v550_v29 = vsel %vm521_vm1, %v544_v22, 0.0 }
 0x211   :  { %v547_v25 = vadd.f32 %v546_v24, %v545_v23 }
 0x213   :  { %v549_v28 = vadd.f32 %v548_v26, %v547_v25 }
 0x215   :  { %v551_v27 = vadd.f32 %v550_v29, %v549_v28 }
 0x217   :  { %v552_v30 = vrot.slane %v551_v27, 4 }
 0x219   :  { %v553_v32 = vadd.f32 %v552_v30, %v551_v27 }
 0x21b   :  { %v554_v33 = vrot.slane %v553_v32, 2 }
 0x21d   :  { %v555_v31 = vadd.f32 %v554_v33, %v553_v32 }
 0x21f   :  { %v556_v34 = vrot.slane %v555_v31, 1 }
 0x221   :  { %v557_v35 = vadd.f32 %v556_v34, %v555_v31 }
 0x223   :  { %v558_v38 = vmul.f32 0.03125, %v557_v35 }
 0x225   :  { %v559_v39 = vadd.f32 1e-05, %v558_v38 }
 0x227   :  { %865 = vrsqrt.f32 %v559_v39 }
 0x231   :  { %v866_v44 = vpop.eup %865 }
 0x232   :  { %v561_v45 = vmul.f32 %v866_v44, %v537_v15  ;;  %v562_v46 = vmul.f32 %v866_v44, %v538_v16  ;;  %v563_v47 = vmul.f32 %v866_v44, %v539_v17  ;;  %v564_v48 = vmul.f32 %v866_v44, %v540_v18 }
 0x234   :  { %v589_v49 = vmul.f32 %v572_v36, %v561_v45  ;;  %v590_v50 = vmul.f32 %v577_v37, %v562_v46  ;;  %v591_v51 = vmul.f32 %v582_v40, %v563_v47  ;;  %v592_v52 = vmul.f32 %v587_v41, %v564_v48 }
 0x236   :  { %v619_v55 = vadd.f32 %v610_v53, %v591_v51  ;;  %v617_v56 = vadd.f32 %v600_v42, %v589_v49  ;;  %v618_v57 = vadd.f32 %v605_v43, %v590_v50  ;;  %v620_v58 = vadd.f32 %v615_v54, %v592_v52 }
 0x238   :  { %623 = vst.msk [vmem:[#allocation2 + $0x10] sm:$0xff] %vm521_vm1, %v619_v55  ;;  %621 = vst.msk [vmem:[#allocation2] sm:$0xff] %vm521_vm1, %v617_v56 }
 0x239   :  { %622 = vst.msk [vmem:[#allocation2 + $0x8] sm:$0xff] %vm521_vm1, %v618_v57  ;;  %624 = vst.msk [vmem:[#allocation2 + $0x18] sm:$0xff] %vm521_vm1, %v620_v58 }
 0x23a   :  { %878 = shalt.err (!%p875_p4)
}
 0x23b   :  { %s879_s0 = scalar_lea.hbm %s1164_s8, 512 }
 0x23c   :  { %p880_p5 = scmp.ne.s32.totalorder %s1164_s8, %s879_s0  ;;  %p883_p6 = scmp.lt.u32.totalorder %s879_s0, %s1164_s8 }
 0x23e   :  { %p885_p7 = pnand %p883_p6, %p880_p5 }
 0x240   :  { %888 = shalt.err (!%p885_p7)
}
 0x241   :  { %s893_s5 = smov 128   ;;  %s894_s23 = smov 8  }
 0x242   :  { %636 = dma.vmem_to_hbm [thread:$0]  %s631_s15, 512, %s1164_s8, [#allocation3], %s893_s5, %s893_s5, %s894_s23  }
 0x243   :  { %889 = dma.done.wait [#allocation3], 512  }
 0x244   :  { %890 = vsyncadd [#allocation3], 4294966784 }
 0x245   :  { %640 = vsyncpa [#allocation3], 1 }

</bundles_post_ra>
